<compile_context>
chip_gen: v6e
topology: v6e:2x2x1
jax: 0.10.0
libtpu: 0.0.40
codegen_flags: <defaults>
</compile_context>

<pallas_src>
import functools

import jax
import jax.numpy as jnp
from jax.experimental import pallas as pl
from jax.experimental.pallas import tpu as pltpu


def _round_up(x, m):
    return (x + m - 1) // m * m


def _mlp_fused_kernel(*refs, num_layers):
    """refs = (x, w_hbm_0, b_0, ..., w_hbm_{L-1}, b_{L-1}, out,
               w_vmem_0 .. w_vmem_{L-1}, dma_sems)."""
    x_ref = refs[0]
    o_ref = refs[2 * num_layers + 1]
    w_hbm = [refs[1 + 2 * l] for l in range(num_layers)]
    b_ref = [refs[2 + 2 * l] for l in range(num_layers)]
    w_vmem = [refs[2 * num_layers + 2 + l] for l in range(num_layers)]
    sem = refs[3 * num_layers + 2]

    first_step = pl.program_id(0) == 0

    # One DMA per layer, HBM -> VMEM scratch.  Issue them all on the first grid
    # step, wait just-in-time per layer so DMA overlaps the previous layer's
    # matmul.  Scratch persists across grid steps -> later steps reuse the
    # already-resident weights (single copy, no re-DMA).
    copies = [pltpu.make_async_copy(w_hbm[l], w_vmem[l], sem.at[l])
              for l in range(num_layers)]

    @pl.when(first_step)
    def _start_all():
        for cp in copies:
            cp.start()

    h = x_ref[...]                                    # f32 activations
    for l in range(num_layers):
        @pl.when(first_step)
        def _wait(cp=copies[l]):
            cp.wait()
        # bf16 operands into the MXU, f32 accumulation; epilogue stays f32.
        y = jnp.dot(h.astype(jnp.bfloat16), w_vmem[l][...],
                    preferred_element_type=jnp.float32) + b_ref[l][...]
        if l < num_layers - 1:
            h = jnp.maximum(y, 0.0)      # ReLU (Dropout p=0 is identity; BN folded)
        else:
            h = jnp.clip(y, 0.0, 1.0)    # eval-mode clamp
    o_ref[...] = h.astype(o_ref.dtype)


def mlp_forward(x, padded_params, *, tm=None, out_dim=None, out_dtype=jnp.float32):
    """Single fused Pallas kernel for the whole MLP.

    x: (M, in_dim) float32.
    padded_params: list of dicts with BN-folded, lane-padded 'w' (Kp, Np) bf16
                   and 'b' (1, Np) f32; the last entry is the final Linear.
    """
    M, in_dim = x.shape
    num_layers = len(padded_params)
    in_p = padded_params[0]["w"].shape[0]
    out_p = padded_params[-1]["w"].shape[1]
    if out_dim is None:
        out_dim = out_p

    # Row tile: whole (8-padded) batch if small; 256 rows fills the v6e/v7x MXU.
    m8 = _round_up(M, 8)
    if tm is None:
        tm = m8 if m8 <= 256 else 256
    assert tm % 8 == 0, "row tile must be a multiple of 8 sublanes"
    m_pad = _round_up(M, tm)

    # Zero-pad batch rows / input features (padded rows are sliced off below;
    # padded input columns hit zero-padded weight rows, so they contribute 0).
    if (m_pad, in_p) != (M, in_dim):
        x_p = jnp.zeros((m_pad, in_p), x.dtype).at[:M, :in_dim].set(x)
    else:
        x_p = x

    flat_inputs = [x_p]
    in_specs = [pl.BlockSpec((tm, in_p), lambda i: (i, 0))]
    scratch_shapes = []
    for p in padded_params:
        flat_inputs += [p["w"], p["b"]]
        in_specs += [
            pl.BlockSpec(memory_space=pl.ANY),                # weight stays in HBM
            pl.BlockSpec(p["b"].shape, lambda i: (0, 0)),     # small bias: VMEM resident
        ]
        scratch_shapes.append(pltpu.VMEM(p["w"].shape, p["w"].dtype))
    scratch_shapes.append(pltpu.SemaphoreType.DMA((num_layers,)))

    # Explicit scoped-VMEM budget: single-copy weights + biases + double-buffered
    # x/out tiles + a few f32 activation temporaries + headroom.
    weight_bytes = sum(int(p["w"].size) * p["w"].dtype.itemsize for p in padded_params)
    bias_bytes = 2 * sum(int(p["b"].size) * p["b"].dtype.itemsize for p in padded_params)
    io_bytes = 2 * tm * in_p * 4 + 2 * tm * out_p * 4
    max_np = max(p["w"].shape[1] for p in padded_params)
    act_bytes = 6 * tm * max_np * 4
    vmem_limit = int(1.25 * (weight_bytes + bias_bytes + io_bytes + act_bytes)) + (8 << 20)
    vmem_limit = min(vmem_limit, 64 << 20)

    kernel = functools.partial(_mlp_fused_kernel, num_layers=num_layers)

    out = pl.pallas_call(
        kernel,
        out_shape=jax.ShapeDtypeStruct((m_pad, out_p), out_dtype),
        grid_spec=pltpu.PrefetchScalarGridSpec(
            num_scalar_prefetch=0,
            grid=(m_pad // tm,),
            in_specs=in_specs,
            out_specs=pl.BlockSpec((tm, out_p), lambda i: (i, 0)),
            scratch_shapes=scratch_shapes,
        ),
        compiler_params=pltpu.CompilerParams(
            # "arbitrary": the step-0 weight load + persistent scratch requires
            # sequential execution of the batch axis on one core.
            dimension_semantics=("arbitrary",),
            vmem_limit_bytes=vmem_limit,
        ),
    )(*flat_inputs)
    return out[:M, :out_dim]


def init_raw_params(key, num_mlp_layers, in_dim, emb_dim, out_dim):
    """Deterministic raw parameters mirroring the PyTorch module's layout.

    Weights are stored as (in_features, out_features) so the kernel does x @ W.
    """
    params = []
    dims = [in_dim] + [emb_dim] * num_mlp_layers
    for li in range(num_mlp_layers):
        key, kw, kb, kg, kbt, km, kv = jax.random.split(key, 7)
        bound = 1.0 / jnp.sqrt(dims[li])
        params.append(dict(
            w=jax.random.uniform(kw, (dims[li], dims[li + 1]), jnp.float32, -bound, bound),
            b=jax.random.uniform(kb, (1, dims[li + 1]), jnp.float32, -bound, bound),
            gamma=jax.random.uniform(kg, (1, dims[li + 1]), jnp.float32, 0.5, 1.5),
            beta=jax.random.uniform(kbt, (1, dims[li + 1]), jnp.float32, -0.5, 0.5),
            rmean=jax.random.uniform(km, (1, dims[li + 1]), jnp.float32, -0.5, 0.5),
            rvar=jax.random.uniform(kv, (1, dims[li + 1]), jnp.float32, 0.5, 1.5),
            has_bn=True,
        ))
    key, kw, kb = jax.random.split(key, 3)
    bound = 1.0 / jnp.sqrt(emb_dim)
    params.append(dict(
        w=jax.random.uniform(kw, (emb_dim, out_dim), jnp.float32, -bound, bound),
        b=jax.random.uniform(kb, (1, out_dim), jnp.float32, -bound, bound),
        has_bn=False,
    ))
    return params


def fold_bn_params(raw_params, eps=1e-5):
    """Host-side fold of eval-mode BatchNorm into each Linear (done in f32)."""
    folded = []
    for p in raw_params:
        if p["has_bn"]:
            scale = p["gamma"] / jnp.sqrt(p["rvar"] + eps)        # (1, N), f32
            w = p["w"] * scale
            b = p["b"] * scale + p["beta"] - p["rmean"] * scale
        else:
            w, b = p["w"], p["b"]
        folded.append(dict(w=w, b=b))
    return folded


def pad_params(folded_params, lane=128):
    """Zero-pad feature dims to multiples of 128 and cast weights to bf16."""
    padded = []
    for p in folded_params:
        K, N = p["w"].shape
        Kp, Np = _round_up(K, lane), _round_up(N, lane)
        w = jnp.zeros((Kp, Np), jnp.float32).at[:K, :N].set(p["w"])
        b = jnp.zeros((1, Np), jnp.float32).at[:, :N].set(p["b"])
        padded.append(dict(w=w.astype(jnp.bfloat16), b=b))   # bf16 MXU operands, f32 bias
        # TODO(synk): optional fp8 weight quantization for the v7x MXU (needs an
        # accuracy budget and per-column scales folded into the bias epilogue).
    return padded


def mlp_emulated(x, padded_params, in_dim, out_dim):
    """Pure-JAX emulation of the kernel's numerics (bf16 operands, f32 accum)."""
    in_p = padded_params[0]["w"].shape[0]
    h = jnp.zeros((x.shape[0], in_p), jnp.float32).at[:, :in_dim].set(x)
    L = len(padded_params)
    for l, p in enumerate(padded_params):
        y = jnp.dot(h.astype(jnp.bfloat16), p["w"],
                    preferred_element_type=jnp.float32) + p["b"]
        h = jnp.maximum(y, 0.0) if l < L - 1 else jnp.clip(y, 0.0, 1.0)
    return h[:, :out_dim]


def mlp_reference(x, raw_params, eps=1e-5):
    """Pure-JAX f32 eval-mode reference of the original module."""
    hp = jax.lax.Precision.HIGHEST
    h = x
    for p in raw_params[:-1]:
        z = jnp.dot(h, p["w"], precision=hp) + p["b"]
        z = (z - p["rmean"]) / jnp.sqrt(p["rvar"] + eps) * p["gamma"] + p["beta"]
        h = jnp.maximum(z, 0.0)
    last = raw_params[-1]
    return jnp.clip(jnp.dot(h, last["w"], precision=hp) + last["b"], 0.0, 1.0)


if __name__ == "__main__":
    key = jax.random.PRNGKey(0)
    num_mlp_layers = 5

    # --- Test 1: unaligned (production-style, shrunk) dims, tiny batch ---
    # in=100 -> pad 128, emb=96 -> pad 128, out=200 -> pad 256; grid=(1,) so the
    # overlapped per-layer weight prefetch path is exercised.
    in_dim, emb_dim, out_dim = 100, 96, 200
    batch = 8
    key, kx, kp = jax.random.split(key, 3)
    x = jax.random.normal(kx, (batch, in_dim), jnp.float32)
    raw = init_raw_params(kp, num_mlp_layers, in_dim, emb_dim, out_dim)
    padded = pad_params(fold_bn_params(raw))

    out = jax.block_until_ready(mlp_forward(x, padded, out_dim=out_dim))
    assert out.shape == (batch, out_dim)
    ref_bf16 = mlp_emulated(x, padded, in_dim, out_dim)
    ref_f32 = mlp_reference(x, raw)
    assert jnp.allclose(out, ref_bf16, atol=1e-4, rtol=1e-4), "mismatch vs bf16 reference"
    assert jnp.allclose(out, ref_f32, atol=5e-2, rtol=5e-2), "mismatch vs f32 reference"

    # --- Test 2: aligned dims, batch not a multiple of the row tile ---
    # batch=40, tm=16 -> padded to 48 rows, grid=(3,): exercises batch padding
    # and weight reuse from persistent VMEM scratch on steps >= 1.
    in2, emb2, out2 = 128, 128, 256
    batch2 = 40
    key, kx2, kp2 = jax.random.split(key, 3)
    x2 = jax.random.normal(kx2, (batch2, in2), jnp.float32)
    raw2 = init_raw_params(kp2, num_mlp_layers, in2, emb2, out2)
    padded2 = pad_params(fold_bn_params(raw2))

    out2_ = jax.block_until_ready(mlp_forward(x2, padded2, tm=16, out_dim=out2))
    assert out2_.shape == (batch2, out2)
    ref2 = mlp_emulated(x2, padded2, in2, out2)
    assert jnp.allclose(out2_, ref2, atol=1e-4, rtol=1e-4), "mismatch vs bf16 reference (tiled)"

    print("KERNEL_OK")
</pallas_src>

<mosaic_0001>
module attributes {stable_mosaic.version = 11 : i64} {
  func.func @_mlp_fused_kernel(%arg0: i32, %arg1: memref<8x128xf32, #tpu.memory_space<vmem>>, %arg2: memref<128x128xbf16, #tpu.memory_space<any>>, %arg3: memref<1x128xf32, #tpu.memory_space<vmem>>, %arg4: memref<128x128xbf16, #tpu.memory_space<any>>, %arg5: memref<1x128xf32, #tpu.memory_space<vmem>>, %arg6: memref<128x128xbf16, #tpu.memory_space<any>>, %arg7: memref<1x128xf32, #tpu.memory_space<vmem>>, %arg8: memref<128x128xbf16, #tpu.memory_space<any>>, %arg9: memref<1x128xf32, #tpu.memory_space<vmem>>, %arg10: memref<128x128xbf16, #tpu.memory_space<any>>, %arg11: memref<1x128xf32, #tpu.memory_space<vmem>>, %arg12: memref<128x256xbf16, #tpu.memory_space<any>>, %arg13: memref<1x256xf32, #tpu.memory_space<vmem>>, %arg14: memref<8x256xf32, #tpu.memory_space<vmem>>, %arg15: memref<128x128xbf16, #tpu.memory_space<vmem>>, %arg16: memref<128x128xbf16, #tpu.memory_space<vmem>>, %arg17: memref<128x128xbf16, #tpu.memory_space<vmem>>, %arg18: memref<128x128xbf16, #tpu.memory_space<vmem>>, %arg19: memref<128x128xbf16, #tpu.memory_space<vmem>>, %arg20: memref<128x256xbf16, #tpu.memory_space<vmem>>, %arg21: memref<6x!tpu.dma_semaphore, #tpu.memory_space<semaphore_mem>>) attributes {dimension_semantics = [#tpu.dimension_semantics<arbitrary>], iteration_bounds = array<i64: 1>, scalar_prefetch = 0 : i64, scratch_operands = 7 : i64, tpu.core_type = #tpu.core_type<tc>, window_params = [{transform_indices = @transform_0, window_bounds = array<i64: 8, 128>}, {}, {pipeline_mode = #tpu.pipeline_mode<synchronous>, transform_indices = @transform_2, window_bounds = array<i64: 1, 128>}, {}, {pipeline_mode = #tpu.pipeline_mode<synchronous>, transform_indices = @transform_4, window_bounds = array<i64: 1, 128>}, {}, {pipeline_mode = #tpu.pipeline_mode<synchronous>, transform_indices = @transform_6, window_bounds = array<i64: 1, 128>}, {}, {pipeline_mode = #tpu.pipeline_mode<synchronous>, transform_indices = @transform_8, window_bounds = array<i64: 1, 128>}, {}, {pipeline_mode = #tpu.pipeline_mode<synchronous>, transform_indices = @transform_10, window_bounds = array<i64: 1, 128>}, {}, {pipeline_mode = #tpu.pipeline_mode<synchronous>, transform_indices = @transform_12, window_bounds = array<i64: 1, 256>}, {transform_indices = @transform_13, window_bounds = array<i64: 8, 256>}]} {
    %c0_i32 = arith.constant 0 : i32
    %0 = arith.cmpi eq, %arg0, %c0_i32 : i32
    %1 = arith.extui %0 : i1 to i32
    %c0_i32_0 = arith.constant 0 : i32
    %c1_i32 = arith.constant 1 : i32
    %c2_i32 = arith.constant 2 : i32
    %c3_i32 = arith.constant 3 : i32
    %c4_i32 = arith.constant 4 : i32
    %c5_i32 = arith.constant 5 : i32
    %c0_i32_1 = arith.constant 0 : i32
    %2 = arith.cmpi ne, %1, %c0_i32_1 : i32
    scf.if %2 {
      %67 = tpu.memref_slice %arg21[%c0_i32_0] : memref<6x!tpu.dma_semaphore, #tpu.memory_space<semaphore_mem>> -> memref<1x!tpu.dma_semaphore, #tpu.memory_space<semaphore_mem>>
      %68 = tpu.memref_squeeze %67 : memref<1x!tpu.dma_semaphore, #tpu.memory_space<semaphore_mem>> -> memref<!tpu.dma_semaphore, #tpu.memory_space<semaphore_mem>>
      tpu.enqueue_dma source(%arg2 : memref<128x128xbf16, #tpu.memory_space<any>>) target(%arg15 : memref<128x128xbf16, #tpu.memory_space<vmem>>) target_semaphore(%68 : memref<!tpu.dma_semaphore, #tpu.memory_space<semaphore_mem>>)
      %69 = tpu.memref_slice %arg21[%c1_i32] : memref<6x!tpu.dma_semaphore, #tpu.memory_space<semaphore_mem>> -> memref<1x!tpu.dma_semaphore, #tpu.memory_space<semaphore_mem>>
      %70 = tpu.memref_squeeze %69 : memref<1x!tpu.dma_semaphore, #tpu.memory_space<semaphore_mem>> -> memref<!tpu.dma_semaphore, #tpu.memory_space<semaphore_mem>>
      tpu.enqueue_dma source(%arg4 : memref<128x128xbf16, #tpu.memory_space<any>>) target(%arg16 : memref<128x128xbf16, #tpu.memory_space<vmem>>) target_semaphore(%70 : memref<!tpu.dma_semaphore, #tpu.memory_space<semaphore_mem>>)
      %71 = tpu.memref_slice %arg21[%c2_i32] : memref<6x!tpu.dma_semaphore, #tpu.memory_space<semaphore_mem>> -> memref<1x!tpu.dma_semaphore, #tpu.memory_space<semaphore_mem>>
      %72 = tpu.memref_squeeze %71 : memref<1x!tpu.dma_semaphore, #tpu.memory_space<semaphore_mem>> -> memref<!tpu.dma_semaphore, #tpu.memory_space<semaphore_mem>>
      tpu.enqueue_dma source(%arg6 : memref<128x128xbf16, #tpu.memory_space<any>>) target(%arg17 : memref<128x128xbf16, #tpu.memory_space<vmem>>) target_semaphore(%72 : memref<!tpu.dma_semaphore, #tpu.memory_space<semaphore_mem>>)
      %73 = tpu.memref_slice %arg21[%c3_i32] : memref<6x!tpu.dma_semaphore, #tpu.memory_space<semaphore_mem>> -> memref<1x!tpu.dma_semaphore, #tpu.memory_space<semaphore_mem>>
      %74 = tpu.memref_squeeze %73 : memref<1x!tpu.dma_semaphore, #tpu.memory_space<semaphore_mem>> -> memref<!tpu.dma_semaphore, #tpu.memory_space<semaphore_mem>>
      tpu.enqueue_dma source(%arg8 : memref<128x128xbf16, #tpu.memory_space<any>>) target(%arg18 : memref<128x128xbf16, #tpu.memory_space<vmem>>) target_semaphore(%74 : memref<!tpu.dma_semaphore, #tpu.memory_space<semaphore_mem>>)
      %75 = tpu.memref_slice %arg21[%c4_i32] : memref<6x!tpu.dma_semaphore, #tpu.memory_space<semaphore_mem>> -> memref<1x!tpu.dma_semaphore, #tpu.memory_space<semaphore_mem>>
      %76 = tpu.memref_squeeze %75 : memref<1x!tpu.dma_semaphore, #tpu.memory_space<semaphore_mem>> -> memref<!tpu.dma_semaphore, #tpu.memory_space<semaphore_mem>>
      tpu.enqueue_dma source(%arg10 : memref<128x128xbf16, #tpu.memory_space<any>>) target(%arg19 : memref<128x128xbf16, #tpu.memory_space<vmem>>) target_semaphore(%76 : memref<!tpu.dma_semaphore, #tpu.memory_space<semaphore_mem>>)
      %77 = tpu.memref_slice %arg21[%c5_i32] : memref<6x!tpu.dma_semaphore, #tpu.memory_space<semaphore_mem>> -> memref<1x!tpu.dma_semaphore, #tpu.memory_space<semaphore_mem>>
      %78 = tpu.memref_squeeze %77 : memref<1x!tpu.dma_semaphore, #tpu.memory_space<semaphore_mem>> -> memref<!tpu.dma_semaphore, #tpu.memory_space<semaphore_mem>>
      tpu.enqueue_dma source(%arg12 : memref<128x256xbf16, #tpu.memory_space<any>>) target(%arg20 : memref<128x256xbf16, #tpu.memory_space<vmem>>) target_semaphore(%78 : memref<!tpu.dma_semaphore, #tpu.memory_space<semaphore_mem>>)
    } else {
    }
    %c0 = arith.constant 0 : index
    %c0_2 = arith.constant 0 : index
    %3 = vector.load %arg1[%c0, %c0_2] : memref<8x128xf32, #tpu.memory_space<vmem>>, vector<8x128xf32>
    %4 = arith.extui %0 : i1 to i32
    %c0_i32_3 = arith.constant 0 : i32
    %c0_i32_4 = arith.constant 0 : i32
    %5 = arith.cmpi ne, %4, %c0_i32_4 : i32
    scf.if %5 {
      %67 = tpu.memref_slice %arg21[%c0_i32_3] : memref<6x!tpu.dma_semaphore, #tpu.memory_space<semaphore_mem>> -> memref<1x!tpu.dma_semaphore, #tpu.memory_space<semaphore_mem>>
      %68 = tpu.memref_squeeze %67 : memref<1x!tpu.dma_semaphore, #tpu.memory_space<semaphore_mem>> -> memref<!tpu.dma_semaphore, #tpu.memory_space<semaphore_mem>>
      tpu.wait_dma2 semaphore(%68 : memref<!tpu.dma_semaphore, #tpu.memory_space<semaphore_mem>>) src(%arg2 : memref<128x128xbf16, #tpu.memory_space<any>>) dst(%arg15 : memref<128x128xbf16, #tpu.memory_space<vmem>>)
    } else {
    }
    %6 = arith.truncf %3 : vector<8x128xf32> to vector<8x128xbf16>
    %c0_5 = arith.constant 0 : index
    %c0_6 = arith.constant 0 : index
    %7 = vector.load %arg15[%c0_5, %c0_6] : memref<128x128xbf16, #tpu.memory_space<vmem>>, vector<128x128xbf16>
    %cst = arith.constant dense<0.000000e+00> : vector<8x128xf32>
    %8 = tpu.matmul %6, %7, %cst {dimension_numbers = #tpu.dot_dimension_numbers<[1], [0], [0], [1], [0, 0, 1, 1], [], []>} : vector<8x128xbf16>, vector<128x128xbf16>, vector<8x128xf32> -> vector<8x128xf32>
    %c0_7 = arith.constant 0 : index
    %c0_8 = arith.constant 0 : index
    %9 = vector.load %arg3[%c0_7, %c0_8] : memref<1x128xf32, #tpu.memory_space<vmem>>, vector<1x128xf32>
    %10 = vector.broadcast %9 : vector<1x128xf32> to vector<8x128xf32>
    %11 = arith.addf %8, %10 : vector<8x128xf32>
    %cst_9 = arith.constant 0.000000e+00 : f32
    %12 = vector.broadcast %cst_9 : f32 to vector<8x128xf32>
    %13 = arith.maximumf %11, %12 : vector<8x128xf32>
    %14 = arith.extui %0 : i1 to i32
    %c1_i32_10 = arith.constant 1 : i32
    %c0_i32_11 = arith.constant 0 : i32
    %15 = arith.cmpi ne, %14, %c0_i32_11 : i32
    scf.if %15 {
      %67 = tpu.memref_slice %arg21[%c1_i32_10] : memref<6x!tpu.dma_semaphore, #tpu.memory_space<semaphore_mem>> -> memref<1x!tpu.dma_semaphore, #tpu.memory_space<semaphore_mem>>
      %68 = tpu.memref_squeeze %67 : memref<1x!tpu.dma_semaphore, #tpu.memory_space<semaphore_mem>> -> memref<!tpu.dma_semaphore, #tpu.memory_space<semaphore_mem>>
      tpu.wait_dma2 semaphore(%68 : memref<!tpu.dma_semaphore, #tpu.memory_space<semaphore_mem>>) src(%arg4 : memref<128x128xbf16, #tpu.memory_space<any>>) dst(%arg16 : memref<128x128xbf16, #tpu.memory_space<vmem>>)
    } else {
    }
    %16 = arith.truncf %13 : vector<8x128xf32> to vector<8x128xbf16>
    %c0_12 = arith.constant 0 : index
    %c0_13 = arith.constant 0 : index
    %17 = vector.load %arg16[%c0_12, %c0_13] : memref<128x128xbf16, #tpu.memory_space<vmem>>, vector<128x128xbf16>
    %cst_14 = arith.constant dense<0.000000e+00> : vector<8x128xf32>
    %18 = tpu.matmul %16, %17, %cst_14 {dimension_numbers = #tpu.dot_dimension_numbers<[1], [0], [0], [1], [0, 0, 1, 1], [], []>} : vector<8x128xbf16>, vector<128x128xbf16>, vector<8x128xf32> -> vector<8x128xf32>
    %c0_15 = arith.constant 0 : index
    %c0_16 = arith.constant 0 : index
    %19 = vector.load %arg5[%c0_15, %c0_16] : memref<1x128xf32, #tpu.memory_space<vmem>>, vector<1x128xf32>
    %20 = vector.broadcast %19 : vector<1x128xf32> to vector<8x128xf32>
    %21 = arith.addf %18, %20 : vector<8x128xf32>
    %cst_17 = arith.constant 0.000000e+00 : f32
    %22 = vector.broadcast %cst_17 : f32 to vector<8x128xf32>
    %23 = arith.maximumf %21, %22 : vector<8x128xf32>
    %24 = arith.extui %0 : i1 to i32
    %c2_i32_18 = arith.constant 2 : i32
    %c0_i32_19 = arith.constant 0 : i32
    %25 = arith.cmpi ne, %24, %c0_i32_19 : i32
    scf.if %25 {
      %67 = tpu.memref_slice %arg21[%c2_i32_18] : memref<6x!tpu.dma_semaphore, #tpu.memory_space<semaphore_mem>> -> memref<1x!tpu.dma_semaphore, #tpu.memory_space<semaphore_mem>>
      %68 = tpu.memref_squeeze %67 : memref<1x!tpu.dma_semaphore, #tpu.memory_space<semaphore_mem>> -> memref<!tpu.dma_semaphore, #tpu.memory_space<semaphore_mem>>
      tpu.wait_dma2 semaphore(%68 : memref<!tpu.dma_semaphore, #tpu.memory_space<semaphore_mem>>) src(%arg6 : memref<128x128xbf16, #tpu.memory_space<any>>) dst(%arg17 : memref<128x128xbf16, #tpu.memory_space<vmem>>)
    } else {
    }
    %26 = arith.truncf %23 : vector<8x128xf32> to vector<8x128xbf16>
    %c0_20 = arith.constant 0 : index
    %c0_21 = arith.constant 0 : index
    %27 = vector.load %arg17[%c0_20, %c0_21] : memref<128x128xbf16, #tpu.memory_space<vmem>>, vector<128x128xbf16>
    %cst_22 = arith.constant dense<0.000000e+00> : vector<8x128xf32>
    %28 = tpu.matmul %26, %27, %cst_22 {dimension_numbers = #tpu.dot_dimension_numbers<[1], [0], [0], [1], [0, 0, 1, 1], [], []>} : vector<8x128xbf16>, vector<128x128xbf16>, vector<8x128xf32> -> vector<8x128xf32>
    %c0_23 = arith.constant 0 : index
    %c0_24 = arith.constant 0 : index
    %29 = vector.load %arg7[%c0_23, %c0_24] : memref<1x128xf32, #tpu.memory_space<vmem>>, vector<1x128xf32>
    %30 = vector.broadcast %29 : vector<1x128xf32> to vector<8x128xf32>
    %31 = arith.addf %28, %30 : vector<8x128xf32>
    %cst_25 = arith.constant 0.000000e+00 : f32
    %32 = vector.broadcast %cst_25 : f32 to vector<8x128xf32>
    %33 = arith.maximumf %31, %32 : vector<8x128xf32>
    %34 = arith.extui %0 : i1 to i32
    %c3_i32_26 = arith.constant 3 : i32
    %c0_i32_27 = arith.constant 0 : i32
    %35 = arith.cmpi ne, %34, %c0_i32_27 : i32
    scf.if %35 {
      %67 = tpu.memref_slice %arg21[%c3_i32_26] : memref<6x!tpu.dma_semaphore, #tpu.memory_space<semaphore_mem>> -> memref<1x!tpu.dma_semaphore, #tpu.memory_space<semaphore_mem>>
      %68 = tpu.memref_squeeze %67 : memref<1x!tpu.dma_semaphore, #tpu.memory_space<semaphore_mem>> -> memref<!tpu.dma_semaphore, #tpu.memory_space<semaphore_mem>>
      tpu.wait_dma2 semaphore(%68 : memref<!tpu.dma_semaphore, #tpu.memory_space<semaphore_mem>>) src(%arg8 : memref<128x128xbf16, #tpu.memory_space<any>>) dst(%arg18 : memref<128x128xbf16, #tpu.memory_space<vmem>>)
    } else {
    }
    %36 = arith.truncf %33 : vector<8x128xf32> to vector<8x128xbf16>
    %c0_28 = arith.constant 0 : index
    %c0_29 = arith.constant 0 : index
    %37 = vector.load %arg18[%c0_28, %c0_29] : memref<128x128xbf16, #tpu.memory_space<vmem>>, vector<128x128xbf16>
    %cst_30 = arith.constant dense<0.000000e+00> : vector<8x128xf32>
    %38 = tpu.matmul %36, %37, %cst_30 {dimension_numbers = #tpu.dot_dimension_numbers<[1], [0], [0], [1], [0, 0, 1, 1], [], []>} : vector<8x128xbf16>, vector<128x128xbf16>, vector<8x128xf32> -> vector<8x128xf32>
    %c0_31 = arith.constant 0 : index
    %c0_32 = arith.constant 0 : index
    %39 = vector.load %arg9[%c0_31, %c0_32] : memref<1x128xf32, #tpu.memory_space<vmem>>, vector<1x128xf32>
    %40 = vector.broadcast %39 : vector<1x128xf32> to vector<8x128xf32>
    %41 = arith.addf %38, %40 : vector<8x128xf32>
    %cst_33 = arith.constant 0.000000e+00 : f32
    %42 = vector.broadcast %cst_33 : f32 to vector<8x128xf32>
    %43 = arith.maximumf %41, %42 : vector<8x128xf32>
    %44 = arith.extui %0 : i1 to i32
    %c4_i32_34 = arith.constant 4 : i32
    %c0_i32_35 = arith.constant 0 : i32
    %45 = arith.cmpi ne, %44, %c0_i32_35 : i32
    scf.if %45 {
      %67 = tpu.memref_slice %arg21[%c4_i32_34] : memref<6x!tpu.dma_semaphore, #tpu.memory_space<semaphore_mem>> -> memref<1x!tpu.dma_semaphore, #tpu.memory_space<semaphore_mem>>
      %68 = tpu.memref_squeeze %67 : memref<1x!tpu.dma_semaphore, #tpu.memory_space<semaphore_mem>> -> memref<!tpu.dma_semaphore, #tpu.memory_space<semaphore_mem>>
      tpu.wait_dma2 semaphore(%68 : memref<!tpu.dma_semaphore, #tpu.memory_space<semaphore_mem>>) src(%arg10 : memref<128x128xbf16, #tpu.memory_space<any>>) dst(%arg19 : memref<128x128xbf16, #tpu.memory_space<vmem>>)
    } else {
    }
    %46 = arith.truncf %43 : vector<8x128xf32> to vector<8x128xbf16>
    %c0_36 = arith.constant 0 : index
    %c0_37 = arith.constant 0 : index
    %47 = vector.load %arg19[%c0_36, %c0_37] : memref<128x128xbf16, #tpu.memory_space<vmem>>, vector<128x128xbf16>
    %cst_38 = arith.constant dense<0.000000e+00> : vector<8x128xf32>
    %48 = tpu.matmul %46, %47, %cst_38 {dimension_numbers = #tpu.dot_dimension_numbers<[1], [0], [0], [1], [0, 0, 1, 1], [], []>} : vector<8x128xbf16>, vector<128x128xbf16>, vector<8x128xf32> -> vector<8x128xf32>
    %c0_39 = arith.constant 0 : index
    %c0_40 = arith.constant 0 : index
    %49 = vector.load %arg11[%c0_39, %c0_40] : memref<1x128xf32, #tpu.memory_space<vmem>>, vector<1x128xf32>
    %50 = vector.broadcast %49 : vector<1x128xf32> to vector<8x128xf32>
    %51 = arith.addf %48, %50 : vector<8x128xf32>
    %cst_41 = arith.constant 0.000000e+00 : f32
    %52 = vector.broadcast %cst_41 : f32 to vector<8x128xf32>
    %53 = arith.maximumf %51, %52 : vector<8x128xf32>
    %54 = arith.extui %0 : i1 to i32
    %c5_i32_42 = arith.constant 5 : i32
    %c0_i32_43 = arith.constant 0 : i32
    %55 = arith.cmpi ne, %54, %c0_i32_43 : i32
    scf.if %55 {
      %67 = tpu.memref_slice %arg21[%c5_i32_42] : memref<6x!tpu.dma_semaphore, #tpu.memory_space<semaphore_mem>> -> memref<1x!tpu.dma_semaphore, #tpu.memory_space<semaphore_mem>>
      %68 = tpu.memref_squeeze %67 : memref<1x!tpu.dma_semaphore, #tpu.memory_space<semaphore_mem>> -> memref<!tpu.dma_semaphore, #tpu.memory_space<semaphore_mem>>
      tpu.wait_dma2 semaphore(%68 : memref<!tpu.dma_semaphore, #tpu.memory_space<semaphore_mem>>) src(%arg12 : memref<128x256xbf16, #tpu.memory_space<any>>) dst(%arg20 : memref<128x256xbf16, #tpu.memory_space<vmem>>)
    } else {
    }
    %56 = arith.truncf %53 : vector<8x128xf32> to vector<8x128xbf16>
    %c0_44 = arith.constant 0 : index
    %c0_45 = arith.constant 0 : index
    %57 = vector.load %arg20[%c0_44, %c0_45] : memref<128x256xbf16, #tpu.memory_space<vmem>>, vector<128x256xbf16>
    %cst_46 = arith.constant dense<0.000000e+00> : vector<8x256xf32>
    %58 = tpu.matmul %56, %57, %cst_46 {dimension_numbers = #tpu.dot_dimension_numbers<[1], [0], [0], [1], [0, 0, 1, 1], [], []>} : vector<8x128xbf16>, vector<128x256xbf16>, vector<8x256xf32> -> vector<8x256xf32>
    %c0_47 = arith.constant 0 : index
    %c0_48 = arith.constant 0 : index
    %59 = vector.load %arg13[%c0_47, %c0_48] : memref<1x256xf32, #tpu.memory_space<vmem>>, vector<1x256xf32>
    %60 = vector.broadcast %59 : vector<1x256xf32> to vector<8x256xf32>
    %61 = arith.addf %58, %60 : vector<8x256xf32>
    %cst_49 = arith.constant 0.000000e+00 : f32
    %cst_50 = arith.constant 1.000000e+00 : f32
    %62 = vector.broadcast %cst_49 : f32 to vector<8x256xf32>
    %63 = arith.maximumf %62, %61 : vector<8x256xf32>
    %64 = vector.broadcast %cst_50 : f32 to vector<8x256xf32>
    %65 = arith.minimumf %64, %63 : vector<8x256xf32>
    %c0_51 = arith.constant 0 : index
    %c0_52 = arith.constant 0 : index
    %66 = vector.load %arg14[%c0_51, %c0_52] : memref<8x256xf32, #tpu.memory_space<vmem>>, vector<8x256xf32>
    tpu.vector_store %arg14[%c0_51, %c0_52], %65 {strides = array<i32>} : memref<8x256xf32, #tpu.memory_space<vmem>>, vector<8x256xf32>,
    return
  }
  func.func @transform_0(%arg0: i32) -> (i32, i32) {
    %c0_i32 = arith.constant 0 : i32
    %c0_i32_0 = arith.constant 0 : i32
    return %arg0, %c0_i32 : i32, i32
  }
  func.func @transform_2(%arg0: i32) -> (i32, i32) {
    %c0_i32 = arith.constant 0 : i32
    %c0_i32_0 = arith.constant 0 : i32
    %c0_i32_1 = arith.constant 0 : i32
    return %c0_i32, %c0_i32_0 : i32, i32
  }
  func.func @transform_4(%arg0: i32) -> (i32, i32) {
    %c0_i32 = arith.constant 0 : i32
    %c0_i32_0 = arith.constant 0 : i32
    %c0_i32_1 = arith.constant 0 : i32
    return %c0_i32, %c0_i32_0 : i32, i32
  }
  func.func @transform_6(%arg0: i32) -> (i32, i32) {
    %c0_i32 = arith.constant 0 : i32
    %c0_i32_0 = arith.constant 0 : i32
    %c0_i32_1 = arith.constant 0 : i32
    return %c0_i32, %c0_i32_0 : i32, i32
  }
  func.func @transform_8(%arg0: i32) -> (i32, i32) {
    %c0_i32 = arith.constant 0 : i32
    %c0_i32_0 = arith.constant 0 : i32
    %c0_i32_1 = arith.constant 0 : i32
    return %c0_i32, %c0_i32_0 : i32, i32
  }
  func.func @transform_10(%arg0: i32) -> (i32, i32) {
    %c0_i32 = arith.constant 0 : i32
    %c0_i32_0 = arith.constant 0 : i32
    %c0_i32_1 = arith.constant 0 : i32
    return %c0_i32, %c0_i32_0 : i32, i32
  }
  func.func @transform_12(%arg0: i32) -> (i32, i32) {
    %c0_i32 = arith.constant 0 : i32
    %c0_i32_0 = arith.constant 0 : i32
    %c0_i32_1 = arith.constant 0 : i32
    return %c0_i32, %c0_i32_0 : i32, i32
  }
  func.func @transform_13(%arg0: i32) -> (i32, i32) {
    %c0_i32 = arith.constant 0 : i32
    %c0_i32_0 = arith.constant 0 : i32
    return %arg0, %c0_i32 : i32, i32
  }
}

</mosaic_0001>

<bundles_post_ra>
// kernel: tpu_custom_call.1
= control target key start
LH: loop header
LB: loop body
LE: loop exit
PB: predicated region body
PF: predicated region fallthrough
CT: control target
= control target key end

     0   :  { %18 = vsyncpa [#allocation10], 0  ;;  %s1586_s0 = inlined_call_operand.hbm [shape: f32[8,128], index: 0, kind: input, shape index: {}]   ;;  %s1587_s1 = inlined_call_operand.hbm [shape: bf16[128,128], index: 1, kind: input, shape index: {}]   ;;  %s1588_s2 = inlined_call_operand.vmem [shape: f32[1,128], index: 2, kind: input, shape index: {}]   ;;  %s1589_s3 = inlined_call_operand.hbm [shape: bf16[128,128], index: 3, kind: input, shape index: {}]   ;;  %s1590_s4 = inlined_call_operand.vmem [shape: f32[1,128], index: 4, kind: input, shape index: {}]   ;;  %s1591_s5 = inlined_call_operand.hbm [shape: bf16[128,128], index: 5, kind: input, shape index: {}]   ;;  %s1592_s6 = inlined_call_operand.vmem [shape: f32[1,128], index: 6, kind: input, shape index: {}]   ;;  %s1593_s7 = inlined_call_operand.hbm [shape: bf16[128,128], index: 7, kind: input, shape index: {}]   ;;  %s1594_s8 = inlined_call_operand.vmem [shape: f32[1,128], index: 8, kind: input, shape index: {}]   ;;  %s1595_s9 = inlined_call_operand.hbm [shape: bf16[128,128], index: 9, kind: input, shape index: {}]   ;;  %s1596_s10 = inlined_call_operand.vmem [shape: f32[1,128], index: 10, kind: input, shape index: {}]   ;;  %s1597_s11 = inlined_call_operand.hbm [shape: bf16[128,256], index: 11, kind: input, shape index: {}]   ;;  %s1598_s12 = inlined_call_operand.vmem [shape: f32[1,256], index: 12, kind: input, shape index: {}]   ;;  %s1599_s13 = inlined_call_operand.hbm [shape: f32[8,256], index: 13, kind: output, shape index: {}]  }
   0x1   :  { %19 = vsyncpa [#allocation11], 0  ;;  %s1409_s25 = smov [#allocation9]  }
   0x2   :  { %s26_s26 = sshll.u32 %s1409_s25, 4  ;;  %s27_s26 = int_to_ptr.vmem [resolvable:$true] %s26_s26 }
   0x3   :  { %s1241_s27 = scalar_lea.vmem %s27_s26, 128  ;;  %p1246_p1 = scmp.lt.s32.totalorder %s27_s26, %s27_s26 }
   0x4   :  { %p1242_p0 = scmp.ne.s32.totalorder %s27_s26, %s1241_s27  ;;  %p1247_p2 = scmp.lt.s32.totalorder %s1241_s27, %s1241_s27 }
   0x6   :  { %p1248_p3 = por %p1247_p2, %p1246_p1 }
   0x8   :  { %p1249_p4 = pnand %p1248_p3, %p1242_p0 }
   0xa   :  { %1252 = shalt.err (!%p1249_p4)
}
   0xb   :  { %29 = dma.hbm_to_vmem [thread:$0]  %s1586_s0, 128, %s27_s26, [#allocation10]  }
   0xc   :  { %1393 = dma.done.wait [#allocation10], 128  }
   0xd   :  { %1394 = vsyncadd [#allocation10], 4294967168  ;;  %s1410_s30 = smov [#allocation2]   ;;  %s1411_s15 = smov [#allocation3]  }
   0xe   :  { %s57_s14 = sshll.u32 %s1410_s30, 4  ;;  %s69_s16 = sshll.u32 %s1411_s15, 4  ;;  %s58_s14 = int_to_ptr.vmem [resolvable:$true] %s57_s14  ;;  %s70_s16 = int_to_ptr.vmem [resolvable:$true] %s69_s16 }
   0xf   :  { %s1261_s17 = scalar_lea.vmem %s58_s14, 1024  ;;  %p1266_p6 = scmp.lt.s32.totalorder %s58_s14, %s58_s14 }
  0x10   :  { %p1262_p5 = scmp.ne.s32.totalorder %s58_s14, %s1261_s17  ;;  %p1267_p7 = scmp.lt.s32.totalorder %s1261_s17, %s1261_s17 }
  0x12   :  { %p1268_p8 = por %p1267_p7, %p1266_p6 }
  0x14   :  { %p1269_p9 = pnand %p1268_p8, %p1262_p5 }
  0x16   :  { %1272 = shalt.err (!%p1269_p9)  }
  0x17   :  { %60 = dma.hbm_to_vmem [thread:$0]  %s1587_s1, 1024, %s58_s14, [#allocation8] }
  0x18   :  { %s1281_s0 = scalar_lea.vmem %s70_s16, 1024  ;;  %p1286_p11 = scmp.lt.s32.totalorder %s70_s16, %s70_s16 }
  0x19   :  { %p1282_p10 = scmp.ne.s32.totalorder %s70_s16, %s1281_s0  ;;  %p1287_p12 = scmp.lt.s32.totalorder %s1281_s0, %s1281_s0 }
  0x1b   :  { %p1288_p13 = por %p1287_p12, %p1286_p11 }
  0x1d   :  { %p1289_p0 = pnand %p1288_p13, %p1282_p10 }
  0x1f   :  { %1292 = shalt.err (!%p1289_p0)  }
  0x20   :  { %72 = dma.hbm_to_vmem [thread:$0]  %s1589_s3, 1024, %s70_s16, [#allocation8 + $0x1]  ;;  %v1499_v0 = vld [vmem:[#allocation9] sm:$0xff] }
  0x21   :  { %s1412_s22 = smov [#allocation4]   ;;  %s1413_s24 = smov [#allocation5]  }
  0x22   :  { %s81_s23 = sshll.u32 %s1412_s22, 4  ;;  %s93_s25 = sshll.u32 %s1413_s24, 4  ;;  %s82_s23 = int_to_ptr.vmem [resolvable:$true] %s81_s23  ;;  %s94_s25 = int_to_ptr.vmem [resolvable:$true] %s93_s25 }
  0x23   :  { %s1301_s1 = scalar_lea.vmem %s82_s23, 1024  ;;  %p1306_p2 = scmp.lt.s32.totalorder %s82_s23, %s82_s23 }
  0x24   :  { %p1302_p1 = scmp.ne.s32.totalorder %s82_s23, %s1301_s1  ;;  %p1307_p3 = scmp.lt.s32.totalorder %s1301_s1, %s1301_s1 }
  0x26   :  { %p1308_p4 = por %p1307_p3, %p1306_p2 }
  0x28   :  { %p1309_p5 = pnand %p1308_p4, %p1302_p1 }
  0x2a   :  { %1312 = shalt.err (!%p1309_p5)  }
  0x2b   :  { %84 = dma.hbm_to_vmem [thread:$0]  %s1591_s5, 1024, %s82_s23, [#allocation8 + $0x2] }
  0x2c   :  { %s1321_s3 = scalar_lea.vmem %s94_s25, 1024  ;;  %p1326_p7 = scmp.lt.s32.totalorder %s94_s25, %s94_s25 }
  0x2d   :  { %p1322_p6 = scmp.ne.s32.totalorder %s94_s25, %s1321_s3  ;;  %p1327_p8 = scmp.lt.s32.totalorder %s1321_s3, %s1321_s3 }
  0x2f   :  { %p1328_p9 = por %p1327_p8, %p1326_p7 }
  0x31   :  { %p1329_p10 = pnand %p1328_p9, %p1322_p6 }
  0x33   :  { %1332 = shalt.err (!%p1329_p10)  }
  0x34   :  { %96 = dma.hbm_to_vmem [thread:$0]  %s1593_s7, 1024, %s94_s25, [#allocation8 + $0x3] }
  0x35   :  { %s1414_s30 = smov [#allocation6]   ;;  %s1415_s15 = smov [#allocation7]  }
  0x36   :  { %s105_s14 = sshll.u32 %s1414_s30, 4  ;;  %s117_s16 = sshll.u32 %s1415_s15, 4  ;;  %s106_s14 = int_to_ptr.vmem [resolvable:$true] %s105_s14  ;;  %s118_s16 = int_to_ptr.vmem [resolvable:$true] %s117_s16 }
  0x37   :  { %s1341_s17 = scalar_lea.vmem %s106_s14, 1024  ;;  %p1346_p12 = scmp.lt.s32.totalorder %s106_s14, %s106_s14 }
  0x38   :  { %p1342_p11 = scmp.ne.s32.totalorder %s106_s14, %s1341_s17  ;;  %p1347_p13 = scmp.lt.s32.totalorder %s1341_s17, %s1341_s17 }
  0x3a   :  { %p1348_p0 = por %p1347_p13, %p1346_p12 }
  0x3c   :  { %p1349_p1 = pnand %p1348_p0, %p1342_p11 }
  0x3e   :  { %1352 = shalt.err (!%p1349_p1)  }
  0x3f   :  { %108 = dma.hbm_to_vmem [thread:$0]  %s1595_s9, 1024, %s106_s14, [#allocation8 + $0x4] }
  0x40   :  { %s1361_s19 = scalar_lea.vmem %s118_s16, 2048  ;;  %p1366_p3 = scmp.lt.s32.totalorder %s118_s16, %s118_s16 }
  0x41   :  { %p1362_p2 = scmp.ne.s32.totalorder %s118_s16, %s1361_s19  ;;  %p1367_p4 = scmp.lt.s32.totalorder %s1361_s19, %s1361_s19 }
  0x43   :  { %p1368_p5 = por %p1367_p4, %p1366_p3 }
  0x45   :  { %p1369_p6 = pnand %p1368_p5, %p1362_p2 }
  0x47   :  { %1372 = shalt.err (!%p1369_p6)  }
  0x48   :  { %120 = dma.hbm_to_vmem [thread:$0]  %s1597_s11, 2048, %s118_s16, [#allocation8 + $0x5] }
  0x49   :  { %1395 = dma.done.wait [#allocation8], 1024 }
  0x4a   :  { %1396 = vsyncadd [#allocation8], 4294966272  ;;  %v1416_v1 = vmov 0.0   ;;  %vm1417_vm0 = vmmov 0   ;;  %v1169_v2 = vld [vmem:[#allocation2 + $0x38] sm:$0xff]   ;;  %v1170_v3 = vld [vmem:[#allocation2 + $0x30] sm:$0xff]   ;;  %v129_v10 = vpack.c.bf16 %v1499_v0, %v1499_v0 }
  0x4b   :  { %1058 = vmatprep.subr.bf16.mxu0 %v1416_v1  ;;  %1074 = vmatprep.mubr.msk.bf16.mxu0 %vm1417_vm0, %v1416_v1  ;;  %v1171_v4 = vld [vmem:[#allocation2 + $0x28] sm:$0xff]   ;;  %v1172_v5 = vld [vmem:[#allocation2 + $0x20] sm:$0xff]   ;;  %v1173_v6 = vld [vmem:[#allocation2 + $0x18] sm:$0xff]  }
  0x4c   :  { %1059 = vmatpush3.bf16.msra.mxu0 %v1169_v2  ;;  %v1174_v7 = vld [vmem:[#allocation2 + $0x10] sm:$0xff]   ;;  %v1175_v8 = vld [vmem:[#allocation2 + $0x8] sm:$0xff]   ;;  %v1176_v9 = vld [vmem:[#allocation2] sm:$0xff]  }
  0x4d   :  { %1060 = vmatprep.subr.bf16.mxu0 %v1416_v1  ;;  %v946_v11 = vld [vmem:[%s1588_s2] ss:$0 sm:$0xff] }
  0x50   :  { %1061 = vmatpush3.bf16.msra.mxu0 %v1170_v3 }
  0x51   :  { %1062 = vmatprep.subr.bf16.mxu0 %v1416_v1 }
  0x54   :  { %1063 = vmatpush3.bf16.msra.mxu0 %v1171_v4 }
  0x55   :  { %1064 = vmatprep.subr.bf16.mxu0 %v1416_v1 }
  0x58   :  { %1065 = vmatpush3.bf16.msra.mxu0 %v1172_v5 }
  0x59   :  { %1066 = vmatprep.subr.bf16.mxu0 %v1416_v1 }
  0x5c   :  { %1067 = vmatpush3.bf16.msra.mxu0 %v1173_v6 }
  0x5d   :  { %1068 = vmatprep.subr.bf16.mxu0 %v1416_v1 }
  0x60   :  { %1069 = vmatpush3.bf16.msra.mxu0 %v1174_v7 }
  0x61   :  { %1070 = vmatprep.subr.bf16.mxu0 %v1416_v1 }
  0x64   :  { %1071 = vmatpush3.bf16.msra.mxu0 %v1175_v8 }
  0x65   :  { %1072 = vmatprep.subr.bf16.mxu0 %v1416_v1 }
  0x68   :  { %1073 = vmatpush3.bf16.msra.mxu0 %v1176_v9 }
  0x6b   :  { %1075 = vmatmul.mubr.bf16.vlgmr.msra.gmra.mxu0 %v129_v10 }
 0x12b   :  { %v235_v12 = vpop.f32.mrf.mxu0 }
 0x12c   :  { %v236_v13 = vadd.f32 %v946_v11, %v235_v12 }
 0x12d   :  { %v1076_v14 = vpop.f32.mrf.mxu0 }
 0x12e   :  { %v241_v15 = vmax.f32 %v236_v13, 0.0 }
 0x12f   :  { %v238_v16 = vpop.f32.mrf.mxu0 }
 0x131   :  { %v1077_v17 = vpop.f32.mrf.mxu0 }
 0x132   :  { %1397 = dma.done.wait [#allocation8 + $0x1], 1024 }
 0x133   :  { %1398 = vsyncadd [#allocation8 + $0x1], 4294966272  ;;  %1078 = vmatprep.subr.bf16.mxu1 %v1416_v1  ;;  %1094 = vmatprep.mubr.msk.bf16.mxu1 %vm1417_vm0, %v1416_v1  ;;  %v1177_v18 = vld [vmem:[#allocation3 + $0x38] sm:$0xff]   ;;  %v1178_v19 = vld [vmem:[#allocation3 + $0x30] sm:$0xff]   ;;  %v250_v26 = vpack.c.bf16 %v241_v15, %v241_v15 }
 0x134   :  { %1079 = vmatpush3.bf16.msra.mxu1 %v1177_v18  ;;  %v1179_v20 = vld [vmem:[#allocation3 + $0x28] sm:$0xff]   ;;  %v1180_v21 = vld [vmem:[#allocation3 + $0x20] sm:$0xff]   ;;  %v1181_v22 = vld [vmem:[#allocation3 + $0x18] sm:$0xff]  }
 0x135   :  { %1080 = vmatprep.subr.bf16.mxu1 %v1416_v1  ;;  %v1182_v23 = vld [vmem:[#allocation3 + $0x10] sm:$0xff]   ;;  %v1183_v24 = vld [vmem:[#allocation3 + $0x8] sm:$0xff]   ;;  %v1184_v25 = vld [vmem:[#allocation3] sm:$0xff]  }
 0x136   :  { %v955_v27 = vld [vmem:[%s1590_s4] ss:$0 sm:$0xff] }
 0x138   :  { %1081 = vmatpush3.bf16.msra.mxu1 %v1178_v19 }
 0x139   :  { %1082 = vmatprep.subr.bf16.mxu1 %v1416_v1 }
 0x13c   :  { %1083 = vmatpush3.bf16.msra.mxu1 %v1179_v20 }
 0x13d   :  { %1084 = vmatprep.subr.bf16.mxu1 %v1416_v1 }
 0x140   :  { %1085 = vmatpush3.bf16.msra.mxu1 %v1180_v21 }
 0x141   :  { %1086 = vmatprep.subr.bf16.mxu1 %v1416_v1 }
 0x144   :  { %1087 = vmatpush3.bf16.msra.mxu1 %v1181_v22 }
 0x145   :  { %1088 = vmatprep.subr.bf16.mxu1 %v1416_v1 }
 0x148   :  { %1089 = vmatpush3.bf16.msra.mxu1 %v1182_v23 }
 0x149   :  { %1090 = vmatprep.subr.bf16.mxu1 %v1416_v1 }
 0x14c   :  { %1091 = vmatpush3.bf16.msra.mxu1 %v1183_v24 }
 0x14d   :  { %1092 = vmatprep.subr.bf16.mxu1 %v1416_v1 }
 0x150   :  { %1093 = vmatpush3.bf16.msra.mxu1 %v1184_v25 }
 0x153   :  { %1095 = vmatmul.mubr.bf16.vlgmr.msra.gmra.mxu1 %v250_v26 }
 0x213   :  { %v356_v28 = vpop.f32.mrf.mxu1 }
 0x214   :  { %v357_v29 = vadd.f32 %v955_v27, %v356_v28 }
 0x215   :  { %v1096_v30 = vpop.f32.mrf.mxu1 }
 0x216   :  { %v362_v31 = vmax.f32 %v357_v29, 0.0 }
 0x217   :  { %v359_v32 = vpop.f32.mrf.mxu1 }
 0x219   :  { %v1097_v33 = vpop.f32.mrf.mxu1 }
 0x21a   :  { %1399 = dma.done.wait [#allocation8 + $0x2], 1024 }
 0x21b   :  { %1400 = vsyncadd [#allocation8 + $0x2], 4294966272  ;;  %1098 = vmatprep.subr.bf16.mxu0 %v1416_v1  ;;  %1114 = vmatprep.mubr.msk.bf16.mxu0 %vm1417_vm0, %v1416_v1  ;;  %v1185_v34 = vld [vmem:[#allocation4 + $0x38] sm:$0xff]   ;;  %v1186_v35 = vld [vmem:[#allocation4 + $0x30] sm:$0xff]   ;;  %v371_v42 = vpack.c.bf16 %v362_v31, %v362_v31 }
 0x21c   :  { %1099 = vmatpush3.bf16.msra.mxu0 %v1185_v34  ;;  %v1187_v36 = vld [vmem:[#allocation4 + $0x28] sm:$0xff]   ;;  %v1188_v37 = vld [vmem:[#allocation4 + $0x20] sm:$0xff]   ;;  %v1189_v38 = vld [vmem:[#allocation4 + $0x18] sm:$0xff]  }
 0x21d   :  { %1100 = vmatprep.subr.bf16.mxu0 %v1416_v1  ;;  %v1190_v39 = vld [vmem:[#allocation4 + $0x10] sm:$0xff]   ;;  %v1191_v40 = vld [vmem:[#allocation4 + $0x8] sm:$0xff]   ;;  %v1192_v41 = vld [vmem:[#allocation4] sm:$0xff]  }
 0x21e   :  { %v964_v43 = vld [vmem:[%s1592_s6] ss:$0 sm:$0xff] }
 0x220   :  { %1101 = vmatpush3.bf16.msra.mxu0 %v1186_v35 }
 0x221   :  { %1102 = vmatprep.subr.bf16.mxu0 %v1416_v1 }
 0x224   :  { %1103 = vmatpush3.bf16.msra.mxu0 %v1187_v36 }
 0x225   :  { %1104 = vmatprep.subr.bf16.mxu0 %v1416_v1 }
 0x228   :  { %1105 = vmatpush3.bf16.msra.mxu0 %v1188_v37 }
 0x229   :  { %1106 = vmatprep.subr.bf16.mxu0 %v1416_v1 }
 0x22c   :  { %1107 = vmatpush3.bf16.msra.mxu0 %v1189_v38 }
 0x22d   :  { %1108 = vmatprep.subr.bf16.mxu0 %v1416_v1 }
 0x230   :  { %1109 = vmatpush3.bf16.msra.mxu0 %v1190_v39 }
 0x231   :  { %1110 = vmatprep.subr.bf16.mxu0 %v1416_v1 }
 0x234   :  { %1111 = vmatpush3.bf16.msra.mxu0 %v1191_v40 }
 0x235   :  { %1112 = vmatprep.subr.bf16.mxu0 %v1416_v1 }
 0x238   :  { %1113 = vmatpush3.bf16.msra.mxu0 %v1192_v41 }
 0x23b   :  { %1115 = vmatmul.mubr.bf16.vlgmr.msra.gmra.mxu0 %v371_v42 }
 0x2fb   :  { %v477_v44 = vpop.f32.mrf.mxu0 }
 0x2fc   :  { %v478_v45 = vadd.f32 %v964_v43, %v477_v44 }
 0x2fd   :  { %v1116_v46 = vpop.f32.mrf.mxu0 }
 0x2fe   :  { %v483_v47 = vmax.f32 %v478_v45, 0.0 }
 0x2ff   :  { %v480_v48 = vpop.f32.mrf.mxu0 }
 0x301   :  { %v1117_v49 = vpop.f32.mrf.mxu0 }
 0x302   :  { %1401 = dma.done.wait [#allocation8 + $0x3], 1024 }
 0x303   :  { %1402 = vsyncadd [#allocation8 + $0x3], 4294966272  ;;  %1118 = vmatprep.subr.bf16.mxu1 %v1416_v1  ;;  %1134 = vmatprep.mubr.msk.bf16.mxu1 %vm1417_vm0, %v1416_v1  ;;  %v1193_v50 = vld [vmem:[#allocation5 + $0x38] sm:$0xff]   ;;  %v1194_v51 = vld [vmem:[#allocation5 + $0x30] sm:$0xff]   ;;  %v492_v58 = vpack.c.bf16 %v483_v47, %v483_v47 }
 0x304   :  { %1119 = vmatpush3.bf16.msra.mxu1 %v1193_v50  ;;  %v1195_v52 = vld [vmem:[#allocation5 + $0x28] sm:$0xff]   ;;  %v1196_v53 = vld [vmem:[#allocation5 + $0x20] sm:$0xff]   ;;  %v1197_v54 = vld [vmem:[#allocation5 + $0x18] sm:$0xff]  }
 0x305   :  { %1120 = vmatprep.subr.bf16.mxu1 %v1416_v1  ;;  %v1198_v55 = vld [vmem:[#allocation5 + $0x10] sm:$0xff]   ;;  %v1199_v56 = vld [vmem:[#allocation5 + $0x8] sm:$0xff]   ;;  %v1200_v57 = vld [vmem:[#allocation5] sm:$0xff]  }
 0x306   :  { %v973_v59 = vld [vmem:[%s1594_s8] ss:$0 sm:$0xff] }
 0x308   :  { %1121 = vmatpush3.bf16.msra.mxu1 %v1194_v51 }
 0x309   :  { %1122 = vmatprep.subr.bf16.mxu1 %v1416_v1 }
 0x30c   :  { %1123 = vmatpush3.bf16.msra.mxu1 %v1195_v52 }
 0x30d   :  { %1124 = vmatprep.subr.bf16.mxu1 %v1416_v1 }
 0x310   :  { %1125 = vmatpush3.bf16.msra.mxu1 %v1196_v53 }
 0x311   :  { %1126 = vmatprep.subr.bf16.mxu1 %v1416_v1 }
 0x314   :  { %1127 = vmatpush3.bf16.msra.mxu1 %v1197_v54 }
 0x315   :  { %1128 = vmatprep.subr.bf16.mxu1 %v1416_v1 }
 0x318   :  { %1129 = vmatpush3.bf16.msra.mxu1 %v1198_v55 }
 0x319   :  { %1130 = vmatprep.subr.bf16.mxu1 %v1416_v1 }
 0x31c   :  { %1131 = vmatpush3.bf16.msra.mxu1 %v1199_v56 }
 0x31d   :  { %1132 = vmatprep.subr.bf16.mxu1 %v1416_v1 }
 0x320   :  { %1133 = vmatpush3.bf16.msra.mxu1 %v1200_v57 }
 0x323   :  { %1135 = vmatmul.mubr.bf16.vlgmr.msra.gmra.mxu1 %v492_v58 }
 0x3e3   :  { %v598_v60 = vpop.f32.mrf.mxu1 }
 0x3e4   :  { %v599_v61 = vadd.f32 %v973_v59, %v598_v60 }
 0x3e5   :  { %v1136_v62 = vpop.f32.mrf.mxu1 }
 0x3e6   :  { %v604_v63 = vmax.f32 %v599_v61, 0.0 }
 0x3e7   :  { %v601_v0 = vpop.f32.mrf.mxu1 }
 0x3e9   :  { %v1137_v2 = vpop.f32.mrf.mxu1 }
 0x3ea   :  { %1403 = dma.done.wait [#allocation8 + $0x4], 1024 }
 0x3eb   :  { %1404 = vsyncadd [#allocation8 + $0x4], 4294966272  ;;  %1138 = vmatprep.subr.bf16.mxu0 %v1416_v1  ;;  %1154 = vmatprep.mubr.msk.bf16.mxu0 %vm1417_vm0, %v1416_v1  ;;  %v1201_v3 = vld [vmem:[#allocation6 + $0x38] sm:$0xff]   ;;  %v1202_v4 = vld [vmem:[#allocation6 + $0x30] sm:$0xff]   ;;  %v613_v11 = vpack.c.bf16 %v604_v63, %v604_v63 }
 0x3ec   :  { %1139 = vmatpush3.bf16.msra.mxu0 %v1201_v3  ;;  %v1203_v5 = vld [vmem:[#allocation6 + $0x28] sm:$0xff]   ;;  %v1204_v6 = vld [vmem:[#allocation6 + $0x20] sm:$0xff]   ;;  %v1205_v7 = vld [vmem:[#allocation6 + $0x18] sm:$0xff]  }
 0x3ed   :  { %1140 = vmatprep.subr.bf16.mxu0 %v1416_v1  ;;  %v1206_v8 = vld [vmem:[#allocation6 + $0x10] sm:$0xff]   ;;  %v1207_v9 = vld [vmem:[#allocation6 + $0x8] sm:$0xff]   ;;  %v1208_v10 = vld [vmem:[#allocation6] sm:$0xff]  }
 0x3ee   :  { %v982_v12 = vld [vmem:[%s1596_s10] ss:$0 sm:$0xff] }
 0x3f0   :  { %1141 = vmatpush3.bf16.msra.mxu0 %v1202_v4 }
 0x3f1   :  { %1142 = vmatprep.subr.bf16.mxu0 %v1416_v1 }
 0x3f4   :  { %1143 = vmatpush3.bf16.msra.mxu0 %v1203_v5 }
 0x3f5   :  { %1144 = vmatprep.subr.bf16.mxu0 %v1416_v1 }
 0x3f8   :  { %1145 = vmatpush3.bf16.msra.mxu0 %v1204_v6 }
 0x3f9   :  { %1146 = vmatprep.subr.bf16.mxu0 %v1416_v1 }
 0x3fc   :  { %1147 = vmatpush3.bf16.msra.mxu0 %v1205_v7 }
 0x3fd   :  { %1148 = vmatprep.subr.bf16.mxu0 %v1416_v1 }
 0x400   :  { %1149 = vmatpush3.bf16.msra.mxu0 %v1206_v8 }
 0x401   :  { %1150 = vmatprep.subr.bf16.mxu0 %v1416_v1 }
 0x404   :  { %1151 = vmatpush3.bf16.msra.mxu0 %v1207_v9 }
 0x405   :  { %1152 = vmatprep.subr.bf16.mxu0 %v1416_v1 }
 0x408   :  { %1153 = vmatpush3.bf16.msra.mxu0 %v1208_v10 }
 0x40b   :  { %1155 = vmatmul.mubr.bf16.vlgmr.msra.gmra.mxu0 %v613_v11 }
 0x4cb   :  { %v719_v13 = vpop.f32.mrf.mxu0 }
 0x4cc   :  { %v720_v14 = vadd.f32 %v982_v12, %v719_v13 }
 0x4cd   :  { %v1156_v15 = vpop.f32.mrf.mxu0 }
 0x4ce   :  { %v725_v16 = vmax.f32 %v720_v14, 0.0 }
 0x4cf   :  { %v722_v17 = vpop.f32.mrf.mxu0 }
 0x4d1   :  { %v1157_v18 = vpop.f32.mrf.mxu0 }
 0x4d2   :  { %1405 = dma.done.wait [#allocation8 + $0x5], 2048 }
 0x4d3   :  { %1406 = vsyncadd [#allocation8 + $0x5], 4294965248  ;;  %v1418_v19 = vmov 0   ;;  %v1209_v20 = vld [vmem:[#allocation7 + $0x74] ss:$8 sps:$4 sm:$0xff]   ;;  %v734_v35 = vpack.c.bf16 %v725_v16, %v725_v16  ;;  %v753_v36 = vlaneseq  ;;  %s1419_s25 = smov [#allocation12]  }
 0x4d4   :  { %875 = vmatprep.mubr.bf16.mxu1 %v1418_v19  ;;  %v1211_v21 = vld [vmem:[#allocation7 + $0x70] ss:$8 sps:$4 sm:$0xff]   ;;  %843 = vmatprep.subr.bf16.mxu1 %v1209_v20  ;;  %v1212_v1 = vld [vmem:[#allocation7 + $0x64] ss:$8 sps:$4 sm:$0xff]   ;;  %v1214_v22 = vld [vmem:[#allocation7 + $0x60] ss:$8 sps:$4 sm:$0xff]  }
 0x4d5   :  { %844 = vmatpush1.bf16.msra.mxu1 %v1211_v21  ;;  %v1215_v23 = vld [vmem:[#allocation7 + $0x54] ss:$8 sps:$4 sm:$0xff]   ;;  %v1217_v24 = vld [vmem:[#allocation7 + $0x50] ss:$8 sps:$4 sm:$0xff]   ;;  %v1218_v25 = vld [vmem:[#allocation7 + $0x44] ss:$8 sps:$4 sm:$0xff]  }
 0x4d6   :  { %845 = vmatprep.subr.bf16.mxu1 %v1212_v1  ;;  %v1220_v26 = vld [vmem:[#allocation7 + $0x40] ss:$8 sps:$4 sm:$0xff]   ;;  %v1221_v27 = vld [vmem:[#allocation7 + $0x34] ss:$8 sps:$4 sm:$0xff]   ;;  %v1223_v28 = vld [vmem:[#allocation7 + $0x30] ss:$8 sps:$4 sm:$0xff]  }
 0x4d7   :  { %v1224_v29 = vld [vmem:[#allocation7 + $0x24] ss:$8 sps:$4 sm:$0xff]   ;;  %v1226_v30 = vld [vmem:[#allocation7 + $0x20] ss:$8 sps:$4 sm:$0xff]   ;;  %v1227_v31 = vld [vmem:[#allocation7 + $0x14] ss:$8 sps:$4 sm:$0xff]  }
 0x4d8   :  { %v1229_v32 = vld [vmem:[#allocation7 + $0x10] ss:$8 sps:$4 sm:$0xff]   ;;  %v1230_v33 = vld [vmem:[#allocation7 + $0x4] ss:$8 sps:$4 sm:$0xff]   ;;  %v1232_v34 = vld [vmem:[#allocation7] ss:$8 sps:$4 sm:$0xff]  }
 0x4d9   :  { %846 = vmatpush1.bf16.msra.mxu1 %v1214_v22  ;;  %v754_v37 = vshrl.u32 %v753_v36, 7  ;;  %v751_v39 = vld [vmem:[%s1598_s12] sm:$0x3]  ;;  %s896_s1 = sshll.u32 %s1419_s25, 4  ;;  %s897_s1 = int_to_ptr.vmem [resolvable:$true] %s896_s1 }
 0x4da   :  { %847 = vmatprep.subr.bf16.mxu1 %v1215_v23  ;;  %s1373_s26 = scalar_lea.vmem %s897_s1, 256  ;;  %p1378_p8 = scmp.lt.s32.totalorder %s897_s1, %s897_s1 }
 0x4db   :  { %v755_v38 = vsub.s32 0, %v754_v37  ;;  %v759_v40 = vsub.s32 1, %v754_v37  ;;  %p1374_p7 = scmp.ne.s32.totalorder %s897_s1, %s1373_s26  ;;  %p1379_p9 = scmp.lt.s32.totalorder %s1373_s26, %s1373_s26 }
 0x4dd   :  { %848 = vmatpush1.bf16.msra.mxu1 %v1217_v24  ;;  %v756_v41 = vrot.slane %v751_v39, %v755_v38  ;;  %v760_v42 = vrot.slane %v751_v39, %v759_v40  ;;  %p1380_p10 = por %p1379_p9, %p1378_p8 }
 0x4de   :  { %849 = vmatprep.subr.bf16.mxu1 %v1218_v25 }
 0x4df   :  { %p1381_p11 = pnand %p1380_p10, %p1374_p7 }
 0x4e1   :  { %850 = vmatpush1.bf16.msra.mxu1 %v1220_v26 }
 0x4e2   :  { %851 = vmatprep.subr.bf16.mxu1 %v1221_v27 }
 0x4e5   :  { %852 = vmatpush1.bf16.msra.mxu1 %v1223_v28 }
 0x4e6   :  { %853 = vmatprep.subr.bf16.mxu1 %v1224_v29 }
 0x4e9   :  { %854 = vmatpush1.bf16.msra.mxu1 %v1226_v30 }
 0x4ea   :  { %855 = vmatprep.subr.bf16.mxu1 %v1227_v31 }
 0x4ed   :  { %856 = vmatpush1.bf16.msra.mxu1 %v1229_v32 }
 0x4ee   :  { %857 = vmatprep.subr.bf16.mxu1 %v1230_v33 }
 0x4f1   :  { %858 = vmatpush1.bf16.msra.mxu1 %v1232_v34 }
 0x4f4   :  { %876 = vmatmul.mubr.bf16.vlgmr.msra.gmra.mxu1 %v734_v35 }
 0x5b4   :  { %v877_v43 = vpop.f32.mrf.mxu1 }
 0x5b5   :  { %v878_v44 = vadd.f32 %v877_v43, %v756_v41 }
 0x5b6   :  { %v879_v45 = vpop.f32.mrf.mxu1 }
 0x5b7   :  { %v884_v46 = vmax.f32 %v878_v44, 0.0  ;;  %v880_v47 = vadd.f32 %v879_v45, %v760_v42 }
 0x5b8   :  { %v881_v48 = vpop.f32.mrf.mxu1 }
 0x5b9   :  { %v886_v49 = vmin.f32 %v884_v46, 1.0  ;;  %v885_v50 = vmax.f32 %v880_v47, 0.0 }
 0x5ba   :  { %v882_v51 = vpop.f32.mrf.mxu1 }
 0x5bb   :  { %888 = vst [vmem:[#allocation12] sm:$0xff] %v886_v49  ;;  %v887_v52 = vmin.f32 %v885_v50, 1.0 }
 0x5bd   :  { %889 = vst [vmem:[#allocation12 + $0x8] sm:$0xff] %v887_v52 }
 0x5be   :  { %1384 = shalt.err (!%p1381_p11)
}
 0x5bf   :  { %899 = dma.vmem_to_hbm [thread:$0]  %s897_s1, 256, %s1599_s13, [#allocation11]  }
 0x5c0   :  { %1407 = dma.done.wait [#allocation11], 256  }
 0x5c1   :  { %1408 = vsyncadd [#allocation11], 4294967040 }
 0x5c2   :  { %903 = vsyncpa [#allocation10], 1 }
 0x5c3   :  { %904 = vsyncpa [#allocation11], 1 }
 0x5c4   :  { %905 = vsyncmov [#allocation8] }
 0x5c7   :  { %s906_s3 = vpop.sfrf %905 }
 0x5c8   :  { %p1007_p12 = scmp.ne.s32.totalorder %s906_s3, 0 }
 0x5ca   :  { %910 = shalt.err (%p1007_p12)  }
 0x5cb   :  { %912 = vsyncmov [#allocation8 + $0x1] }
 0x5ce   :  { %s913_s28 = vpop.sfrf %912 }
 0x5cf   :  { %p1008_p13 = scmp.ne.s32.totalorder %s913_s28, 0 }
 0x5d1   :  { %917 = shalt.err (%p1008_p13)  }
 0x5d2   :  { %919 = vsyncmov [#allocation8 + $0x2] }
 0x5d5   :  { %s920_s29 = vpop.sfrf %919 }
 0x5d6   :  { %p1009_p0 = scmp.ne.s32.totalorder %s920_s29, 0 }
 0x5d8   :  { %924 = shalt.err (%p1009_p0)  }
 0x5d9   :  { %926 = vsyncmov [#allocation8 + $0x3] }
 0x5dc   :  { %s927_s30 = vpop.sfrf %926 }
 0x5dd   :  { %p1010_p1 = scmp.ne.s32.totalorder %s927_s30, 0 }
 0x5df   :  { %931 = shalt.err (%p1010_p1)  }
 0x5e0   :  { %933 = vsyncmov [#allocation8 + $0x4] }
 0x5e3   :  { %s934_s13 = vpop.sfrf %933 }
 0x5e4   :  { %p1011_p2 = scmp.ne.s32.totalorder %s934_s13, 0 }
 0x5e6   :  { %938 = shalt.err (%p1011_p2)  }
 0x5e7   :  { %940 = vsyncmov [#allocation8 + $0x5] }
 0x5ea   :  { %s941_s14 = vpop.sfrf %940 }
 0x5eb   :  { %p1012_p3 = scmp.ne.s32.totalorder %s941_s14, 0 }
 0x5ed   :  { %945 = shalt.err (%p1012_p3)  }

</bundles_post_ra>
